<compile_context>
chip_gen: v7x
topology: tpu7x:2x2x1
jax: 0.10.0
libtpu: 0.0.40
codegen_flags: <defaults>
</compile_context>

<pallas_src>
import numpy as np
import jax
import jax.numpy as jnp
from jax import lax
from jax.experimental import pallas as pl
from jax.experimental.pallas import tpu as pltpu


def _linker_kernel(starts_ref, ends_ref, seq_ref, hid_ref):
    # starts_ref/ends_ref: (TB, 1, K=L*M) int32 span boundaries (inclusive)
    # seq_ref:             (TB, S, H)     native-dtype hidden states
    # hid_ref:             (TB, L, H)     f32 per-link pooled hidden (output)
    TB, _, K = starts_ref.shape
    _, S, H = seq_ref.shape
    L = hid_ref.shape[1]
    M = K // L

    starts = starts_ref[...].reshape(TB, K)                       # (TB, K)
    # Clamp like Python slicing does: seq[s:e+1] never reads past S-1.
    ends = jnp.minimum(ends_ref[...].reshape(TB, K), S - 1)       # (TB, K)
    counts = jnp.maximum(ends - starts + 1, 1).astype(jnp.float32)
    inv = 1.0 / counts                                            # hoisted recip

    # 0/1 in-span mask; single non-batched iota, broadcast against spans.
    pos = lax.broadcasted_iota(jnp.int32, (1, K, S), 2)
    in_span = (pos >= starts[..., None]) & (pos <= ends[..., None])
    mask = in_span.astype(seq_ref.dtype)                          # (TB, K, S)

    # Span SUMS via one batched MXU matmul, f32 accumulation.
    sums = jnp.einsum("bks,bsh->bkh", mask, seq_ref[...],
                      preferred_element_type=jnp.float32)         # (TB, K, H)

    # Post-matmul 1/count scale -> span means, then max-pool over mentions.
    means = sums * inv[..., None]                                 # (TB, K, H)
    link_h = jnp.max(means.reshape(TB, L, M, H), axis=2)          # (TB, L, H)
    hid_ref[...] = link_h.astype(hid_ref.dtype)


def linker_forward(seq_hiddens, links_spans, w_scorer, b_scorer, *, batch_block=None):
    """seq_hiddens: (B, S, H); links_spans: (B, L, M, 2) int (inclusive spans).

    Returns (link_logits (B, L), link_hiddens (B, L, H) f32, best_idx (B,)).
    """
    B, S, H = seq_hiddens.shape
    _, L, M, _ = links_spans.shape
    K = L * M

    # Pre-flattened, lane-dense span tensors: (B, 1, K).
    starts = links_spans[..., 0].astype(jnp.int32).reshape(B, 1, K)
    ends = links_spans[..., 1].astype(jnp.int32).reshape(B, 1, K)
    w = jnp.asarray(w_scorer).reshape(H).astype(jnp.float32)
    b = jnp.asarray(b_scorer).reshape(()).astype(jnp.float32)

    itemsize = jnp.dtype(seq_hiddens.dtype).itemsize

    # Generation-aware VMEM budgeting.
    try:
        vmem_cap = int(pltpu.get_tpu_info().vmem_capacity_bytes)
    except Exception:  # pragma: no cover - conservative fallback
        vmem_cap = 64 << 20
    if vmem_cap >= (100 << 20):        # v5e / v6e: 128 MiB physical VMEM
        budget = 80 << 20
        vmem_cap_limit = 96 << 20
    else:                              # v7x: 64 MiB physical VMEM
        budget = 32 << 20
        vmem_cap_limit = 48 << 20

    # Per-batch-element VMEM footprint (double-buffered seq/out + in-kernel temps).
    per_b = (2 * S * H * itemsize        # double-buffered seq tile
             + K * S * itemsize          # in-span mask
             + 2 * K * H * 4             # span sums / means (f32)
             + 2 * L * H * 4             # double-buffered pooled output
             + 8 * K * 4)                # spans / counts / reciprocals
    per_b = max(per_b, 1)

    if batch_block is None:
        tb = max(1, min(B, budget // per_b))
        # Keep >= 2 grid steps so a 2-TensorCore chip (v7x) can split the grid.
        if B >= 2 and -(-B // tb) < 2:
            tb = -(-B // 2)
    else:
        tb = max(1, min(B, int(batch_block)))
    G = -(-B // tb)
    B_pad = G * tb

    if B_pad != B:
        pad = B_pad - B
        seq_hiddens = jnp.pad(seq_hiddens, ((0, pad), (0, 0), (0, 0)))
        starts = jnp.pad(starts, ((0, pad), (0, 0), (0, 0)))   # span [0,0] -> count 1
        ends = jnp.pad(ends, ((0, pad), (0, 0), (0, 0)))

    vmem_limit = int(min(max(per_b * tb + (8 << 20), 32 << 20), vmem_cap_limit))

    cost = pl.CostEstimate(
        flops=2 * B_pad * K * S * H,
        transcendentals=0,
        bytes_accessed=(B_pad * S * H * itemsize      # seq
                        + 2 * B_pad * K * 4           # spans
                        + B_pad * L * H * 4))         # pooled hiddens

    hid_pad = pl.pallas_call(
        _linker_kernel,
        out_shape=jax.ShapeDtypeStruct((B_pad, L, H), jnp.float32),
        grid_spec=pltpu.PrefetchScalarGridSpec(
            num_scalar_prefetch=0,
            grid=(G,),
            in_specs=[
                pl.BlockSpec((tb, 1, K), lambda i: (i, 0, 0)),   # starts
                pl.BlockSpec((tb, 1, K), lambda i: (i, 0, 0)),   # ends
                pl.BlockSpec((tb, S, H), lambda i: (i, 0, 0)),   # seq (native dtype)
            ],
            out_specs=pl.BlockSpec((tb, L, H), lambda i: (i, 0, 0)),
        ),
        compiler_params=pltpu.CompilerParams(
            dimension_semantics=("parallel",),
            vmem_limit_bytes=vmem_limit),
        cost_estimate=cost,
    )(starts, ends, seq_hiddens)

    hid = hid_pad[:B]
    # Scorer (Linear(H,1)) + bias + argmax: trivial fused XLA ops on data
    # already in HBM; keeps the kernel's only output lane-dense (L, H) tiles.
    link_logits = jnp.einsum("blh,h->bl", hid, w) + b
    best_idx = jnp.argmax(link_logits, axis=-1).astype(jnp.int32)
    return link_logits, hid, best_idx


def _reference_forward(seq, spans, w, b):
    seq = np.asarray(seq, dtype=np.float32)
    spans = np.asarray(spans)
    w = np.asarray(w).reshape(-1)
    bias = float(np.asarray(b).reshape(()))
    B, S, H = seq.shape
    _, L, M, _ = spans.shape
    hids = np.zeros((B, L, H), np.float32)
    logits = np.zeros((B, L), np.float32)
    best = np.zeros((B,), np.int32)
    for i in range(B):
        for l in range(L):
            means = []
            for m in range(M):
                s, e = int(spans[i, l, m, 0]), int(spans[i, l, m, 1])
                means.append(seq[i, s:e + 1].mean(0))
            hids[i, l] = np.stack(means, 0).max(0)
        logits[i] = hids[i] @ w + bias
        best[i] = int(np.argmax(logits[i]))
    return logits, hids, best


if __name__ == "__main__":
    B, S, H = 2, 16, 32    # batch, sequence length, hidden_size
    L, M = 6, 3            # links per example, mentions (spans) per link

    key = jax.random.PRNGKey(0)
    k_seq, k_w, k_b, k_start, k_len = jax.random.split(key, 5)

    seq_hiddens = jax.random.normal(k_seq, (B, S, H), dtype=jnp.float32)

    # Scorer params (nn.Linear(hidden_size, 1): weight (1, H), bias (1,)).
    w_scorer = jax.random.normal(k_w, (1, H), dtype=jnp.float32) * 0.1
    b_scorer = jax.random.normal(k_b, (1,), dtype=jnp.float32) * 0.1

    # Span boundaries: start in [0, S-4], end = start + len, len in [0, 3].
    starts = jax.random.randint(k_start, (B, L, M), 0, S - 4)
    lens = jax.random.randint(k_len, (B, L, M), 0, 4)
    ends = starts + lens
    links_spans = jnp.stack([starts, ends], axis=-1).astype(jnp.int32)  # (B, L, M, 2)

    link_logits, link_hiddens, best_idx = jax.block_until_ready(
        linker_forward(seq_hiddens, links_spans, w_scorer, b_scorer))

    ref_logits, ref_hiddens, ref_best = _reference_forward(
        seq_hiddens, links_spans, w_scorer, b_scorer)

    assert np.allclose(np.asarray(link_hiddens), ref_hiddens, atol=1e-5), "hiddens mismatch"
    assert np.allclose(np.asarray(link_logits), ref_logits, atol=1e-5), "logits mismatch"
    assert np.array_equal(np.asarray(best_idx), ref_best), "best_idx mismatch"

    # TODO(synk): degenerate/empty spans (end < start or start >= S) are
    # regularized to a zero-vector mean with count 1; the ragged PyTorch
    # reference would error on such input.
    print("KERNEL_OK")
</pallas_src>

<mosaic_0001>
module attributes {stable_mosaic.version = 11 : i64} {
  func.func @_linker_kernel(%arg0: i32, %arg1: memref<1x1x18xi32, #tpu.memory_space<vmem>>, %arg2: memref<1x1x18xi32, #tpu.memory_space<vmem>>, %arg3: memref<1x16x32xf32, #tpu.memory_space<vmem>>, %arg4: memref<1x6x32xf32, #tpu.memory_space<vmem>>) attributes {dimension_semantics = [#tpu.dimension_semantics<parallel>], iteration_bounds = array<i64: 2>, scalar_prefetch = 0 : i64, scratch_operands = 0 : i64, tpu.core_type = #tpu.core_type<tc>, window_params = [{transform_indices = @transform_0, window_bounds = array<i64: 1, 1, 18>}, {transform_indices = @transform_1, window_bounds = array<i64: 1, 1, 18>}, {transform_indices = @transform_2, window_bounds = array<i64: 1, 16, 32>}, {transform_indices = @transform_3, window_bounds = array<i64: 1, 6, 32>}]} {
    %c0 = arith.constant 0 : index
    %c0_0 = arith.constant 0 : index
    %c0_1 = arith.constant 0 : index
    %0 = vector.load %arg1[%c0, %c0_0, %c0_1] : memref<1x1x18xi32, #tpu.memory_space<vmem>>, vector<1x1x18xi32>
    %1 = vector.shape_cast %0 : vector<1x1x18xi32> to vector<1x18xi32>
    %c0_2 = arith.constant 0 : index
    %c0_3 = arith.constant 0 : index
    %c0_4 = arith.constant 0 : index
    %2 = vector.load %arg2[%c0_2, %c0_3, %c0_4] : memref<1x1x18xi32, #tpu.memory_space<vmem>>, vector<1x1x18xi32>
    %3 = vector.shape_cast %2 : vector<1x1x18xi32> to vector<1x18xi32>
    %c15_i32 = arith.constant 15 : i32
    %4 = vector.broadcast %c15_i32 : i32 to vector<1x18xi32>
    %5 = arith.minsi %3, %4 : vector<1x18xi32>
    %6 = arith.subi %5, %1 : vector<1x18xi32>
    %c1_i32 = arith.constant 1 : i32
    %7 = vector.broadcast %c1_i32 : i32 to vector<1x18xi32>
    %8 = arith.addi %6, %7 : vector<1x18xi32>
    %c1_i32_5 = arith.constant 1 : i32
    %9 = vector.broadcast %c1_i32_5 : i32 to vector<1x18xi32>
    %10 = arith.maxsi %8, %9 : vector<1x18xi32>
    %11 = arith.sitofp %10 : vector<1x18xi32> to vector<1x18xf32>
    %cst = arith.constant 1.000000e+00 : f32
    %12 = vector.broadcast %cst : f32 to vector<1x18xf32>
    %13 = arith.divf %12, %11 : vector<1x18xf32>
    %14 = tpu.iota {dimensions = array<i32: 2>} : vector<1x18x16xi32>
    %15 = vector.shape_cast %1 : vector<1x18xi32> to vector<1x18x1xi32>
    %16 = vector.broadcast %15 : vector<1x18x1xi32> to vector<1x18x16xi32>
    %17 = arith.cmpi sge, %14, %16 : vector<1x18x16xi32>
    %18 = vector.shape_cast %5 : vector<1x18xi32> to vector<1x18x1xi32>
    %19 = vector.broadcast %18 : vector<1x18x1xi32> to vector<1x18x16xi32>
    %20 = arith.cmpi sle, %14, %19 : vector<1x18x16xi32>
    %21 = arith.andi %17, %20 : vector<1x18x16xi1>
    %22 = arith.extui %21 : vector<1x18x16xi1> to vector<1x18x16xi32>
    %23 = arith.sitofp %22 : vector<1x18x16xi32> to vector<1x18x16xf32>
    %c0_6 = arith.constant 0 : index
    %c0_7 = arith.constant 0 : index
    %c0_8 = arith.constant 0 : index
    %24 = vector.load %arg3[%c0_6, %c0_7, %c0_8] : memref<1x16x32xf32, #tpu.memory_space<vmem>>, vector<1x16x32xf32>
    "tpu.trace_start"() <{level = 10 : i32, message = "bks,bsh->bkh"}> : () -> ()
    %cst_9 = arith.constant dense<0.000000e+00> : vector<1x18x32xf32>
    %25 = tpu.matmul %23, %24, %cst_9 {dimension_numbers = #tpu.dot_dimension_numbers<[2], [1], [1], [2], [0, 0, 0, 1, 1, 2], [0], [0]>} : vector<1x18x16xf32>, vector<1x16x32xf32>, vector<1x18x32xf32> -> vector<1x18x32xf32>
    "tpu.trace_stop"() : () -> ()
    %26 = vector.shape_cast %13 : vector<1x18xf32> to vector<1x18x1xf32>
    %27 = vector.broadcast %26 : vector<1x18x1xf32> to vector<1x18x32xf32>
    %28 = arith.mulf %25, %27 : vector<1x18x32xf32>
    %29 = vector.shape_cast %28 : vector<1x18x32xf32> to vector<1x6x3x32xf32>
    %cst_10 = arith.constant dense<0xFF800000> : vector<1x6x32xf32>
    %30 = vector.multi_reduction <maximumf>, %29, %cst_10 [2] : vector<1x6x3x32xf32> to vector<1x6x32xf32>
    %c0_11 = arith.constant 0 : index
    %c0_12 = arith.constant 0 : index
    %c0_13 = arith.constant 0 : index
    %31 = vector.load %arg4[%c0_11, %c0_12, %c0_13] : memref<1x6x32xf32, #tpu.memory_space<vmem>>, vector<1x6x32xf32>
    tpu.vector_store %arg4[%c0_11, %c0_12, %c0_13], %30 {strides = array<i32>} : memref<1x6x32xf32, #tpu.memory_space<vmem>>, vector<1x6x32xf32>,
    return
  }
  func.func @transform_0(%arg0: i32) -> (i32, i32, i32) {
    %c0_i32 = arith.constant 0 : i32
    %c0_i32_0 = arith.constant 0 : i32
    %c0_i32_1 = arith.constant 0 : i32
    return %arg0, %c0_i32, %c0_i32_0 : i32, i32, i32
  }
  func.func @transform_1(%arg0: i32) -> (i32, i32, i32) {
    %c0_i32 = arith.constant 0 : i32
    %c0_i32_0 = arith.constant 0 : i32
    %c0_i32_1 = arith.constant 0 : i32
    return %arg0, %c0_i32, %c0_i32_0 : i32, i32, i32
  }
  func.func @transform_2(%arg0: i32) -> (i32, i32, i32) {
    %c0_i32 = arith.constant 0 : i32
    %c0_i32_0 = arith.constant 0 : i32
    %c0_i32_1 = arith.constant 0 : i32
    return %arg0, %c0_i32, %c0_i32_0 : i32, i32, i32
  }
  func.func @transform_3(%arg0: i32) -> (i32, i32, i32) {
    %c0_i32 = arith.constant 0 : i32
    %c0_i32_0 = arith.constant 0 : i32
    %c0_i32_1 = arith.constant 0 : i32
    return %arg0, %c0_i32, %c0_i32_0 : i32, i32, i32
  }
}

</mosaic_0001>

<bundles_post_ra>
// kernel: tpu_custom_call.1
= control target key start
LH: loop header
LB: loop body
LE: loop exit
PB: predicated region body
PF: predicated region fallthrough
CT: control target
= control target key end

     0   :  { %8 = vsyncpa [#allocation3], 0  ;;  %s1264_s0 = inlined_call_operand.hbm [shape: s32[2,1,18], index: 0, kind: input, shape index: {}]   ;;  %s1265_s1 = inlined_call_operand.vmem [shape: s32[2,1,18], index: 1, kind: input, shape index: {}]   ;;  %s1266_s2 = inlined_call_operand.hbm [shape: f32[2,16,32], index: 2, kind: input, shape index: {}]   ;;  %s1267_s3 = inlined_call_operand.vmem [shape: f32[2,6,32], index: 3, kind: output, shape index: {}]  }
   0x1   :  { %10 = vsyncpa [#allocation3 + $0x1], 0 }
   0x2   :  { %11 = vsyncpa [#allocation5], 0 }
   0x3   :  { %13 = vsyncpa [#allocation5 + $0x1], 0  ;;  %s1051_s12 = smov 0   ;;  %s1053_s13 = smov 0  }
   0x4   :  { %s1055_s14 = smov 0   ;;  %s1057_s15 = smov 0  }
   0x5 LB: > { %s1070_s16 = sadd.s32 4294967295, %s1021_s15   ;;  %s1073_s17 = sadd.s32 1, %s1021_s15   ;;  %s1021_s15 = sphi %s1057_s15, %s1278_s15   ;;  %s1017_s14 = sphi %s1055_s14, %s1277_s14   ;;  %s1013_s13 = sphi %s1053_s13, %s1276_s13   ;;  %s1009_s12 = sphi %s1051_s12, %s1275_s12  }
   0x6   : > { %s23_s18 = ssub.s32 %s1021_s15, %s1073_s17  ;;  %s26_s19 = sadd.s32 1, %s1017_s14 }
   0x7   : > { %p24_p0 = scmp.eq.s32.totalorder %s23_s18, 0  ;;  %p33_p1 = scmp.ne.s32.totalorder %s1017_s14, %s1013_s13 }
   0x8   : > { %p34_p2 = scmp.eq.s32.totalorder %s1021_s15, 0  ;;  %p39_p3 = scmp.ne.s32.totalorder %s1013_s13, %s1009_s12 }
   0x9   : > { %s1083_s20 = scalar_select %p24_p0, %s1017_s14, %s26_s19  }
   0xa   : > { %p35_p4 = por %p34_p2, %p33_p1  ;;  %p40_p5 = scmp.eq.s32.totalorder %s1070_s16, 0 }
   0xb   : > { %p882_p6 = scmp.lt.s32.totalorder %s1021_s15, 2  ;;  %s1092_s22 = sand.u32 1, %s1017_s14  }
   0xc   : > { %p1087_p7 = por %p40_p5, %p39_p3  ;;  %s831_s23 = sshll.u32 %s1021_s15, 4 }
   0xd   : > { %s144_s24 = scalar_lea.vmem [#allocation2], %s1092_s22  ;;  %s1099_s28 = scalar_lea.hbm %s1264_s0, %s831_s23 }
   0xe   : > { %s1269_s21 = scalar_select %p1087_p7, 1, 0 }
   0xf   : > { %s151_s25 = sshll.u32 %s144_s24, 4  ;;  %p1103_p8 = pnand %p882_p6, %p35_p4  ;;  %s1101_s25 = int_to_ptr.vmem [resolvable:$true] %s151_s25 }
  0x10   : > { %s832_s30 = sshll.u32 %s1092_s22, 4  ;;  %s142_s4 = scalar_lea.sflag [#allocation3], %s1092_s22 }
  0x11   : > { %s923_s5 = scalar_lea.hbm %s1099_s28, 16  ;;  %p925_p12 = pneg %p1103_p8 }
  0x12   : > { %p924_p11 = scmp.ne.s32.totalorder %s1099_s28, %s923_s5  ;;  %s928_s8 = scalar_lea.hbm %s1264_s0, 32 }
  0x13   : > { %p929_p1 = scmp.lt.u32.totalorder %s1099_s28, %s1264_s0  ;;  %p930_p2 = scmp.lt.u32.totalorder %s928_s8, %s923_s5 }
  0x14   : > { %p926_p13 = pnand %p925_p12, %p924_p11  ;;  %p932_p4 = scmp.lt.u32.totalorder %s923_s5, %s1099_s28 }
  0x15   : > { %p931_p3 = por %p930_p2, %p929_p1 }
  0x16   : > { %p927_p0 = pneg %p926_p13 }
  0x17   : > { %p933_p5 = por %p932_p4, %p931_p3 }
  0x19   : > { %p934_p6 = pnand %p933_p5, %p927_p0 }
  0x1b   : > { %937 = shalt.err (!%p934_p6)
}
  0x1c   : > { %s938_s11 = scalar_lea.vmem %s1101_s25, 16  ;;  %s1023_s12 = smov [#allocation2]  }
  0x1d   : > { %p939_p11 = scmp.ne.s32.totalorder %s1101_s25, %s938_s11  ;;  %s943_s18 = sshll.u32 %s1023_s12, 4  ;;  %s944_s18 = int_to_ptr.vmem [resolvable:$false] %s943_s18 }
  0x1e   : > { %s945_s19 = scalar_lea.vmem %s944_s18, 32  ;;  %p946_p10 = scmp.lt.s32.totalorder %s1101_s25, %s944_s18 }
  0x1f   : > { %p941_p13 = pnand %p939_p11, %p925_p12  ;;  %p947_p1 = scmp.lt.s32.totalorder %s945_s19, %s938_s11 }
  0x21   : > { %p942_p9 = pneg %p941_p13  ;;  %p948_p2 = por %p947_p1, %p946_p10 }
  0x23   : > { %p949_p3 = pnand %p948_p2, %p942_p9 }
  0x25   : > { %952 = shalt.err (!%p949_p3)
}
  0x26   : > { %878 = dma.hbm_to_vmem [thread:$0]  (!%p1103_p8), %s1099_s28, 16, %s1101_s25, %s142_s4  }
  0x27   : > { %p1271_p0 = scmp.lt.s32.totalorder %s1021_s15, 3  ;;  %p1272_p4 = scmp.ge.s32.totalorder %s1021_s15, 1 }
  0x28   : > { %s847_s24 = sshll.u32 %s1021_s15, 8  ;;  %s168_s26 = scalar_lea.vmem [#allocation4], %s832_s30 }
  0x29   : > { %p1140_p5 = pnand %p1272_p4, %p1271_p0  ;;  %s175_s27 = sshll.u32 %s168_s26, 4  ;;  %s1152_s27 = int_to_ptr.vmem [resolvable:$true] %s175_s27 }
  0x2a   : > { %s1150_s7 = scalar_lea.hbm %s1266_s2, %s847_s24  ;;  %s165_s25 = scalar_lea.sflag [#allocation5], %s1092_s22 }
  0x2b   : > { %s953_s28 = scalar_lea.hbm %s1150_s7, 256  ;;  %s958_s4 = scalar_lea.hbm %s1266_s2, 512 }
  0x2c   : > { %p954_p9 = scmp.ne.s32.totalorder %s1150_s7, %s953_s28  ;;  %p959_p11 = scmp.lt.u32.totalorder %s1150_s7, %s1266_s2 }
  0x2d   : > { %p960_p13 = scmp.lt.u32.totalorder %s958_s4, %s953_s28  ;;  %p962_p2 = scmp.lt.u32.totalorder %s953_s28, %s1150_s7 }
  0x2e   : > { %p956_p10 = pnand %p954_p9, %p925_p12 }
  0x2f   : > { %p961_p1 = por %p960_p13, %p959_p11 }
  0x30   : > { %p957_p6 = pneg %p956_p10 }
  0x31   : > { %p963_p3 = por %p962_p2, %p961_p1 }
  0x33   : > { %p964_p0 = pnand %p963_p3, %p957_p6 }
  0x35   : > { %967 = shalt.err (!%p964_p0)
}
  0x36   : > { %s968_s10 = scalar_lea.vmem %s1152_s27, 256  ;;  %s1024_s11 = smov [#allocation4]  }
  0x37   : > { %p969_p4 = scmp.ne.s32.totalorder %s1152_s27, %s968_s10  ;;  %s973_s12 = sshll.u32 %s1024_s11, 4  ;;  %s974_s12 = int_to_ptr.vmem [resolvable:$false] %s973_s12 }
  0x38   : > { %s975_s18 = scalar_lea.vmem %s974_s12, 512  ;;  %p976_p7 = scmp.lt.s32.totalorder %s1152_s27, %s974_s12 }
  0x39   : > { %p971_p9 = pnand %p969_p4, %p925_p12  ;;  %p977_p11 = scmp.lt.s32.totalorder %s975_s18, %s968_s10 }
  0x3b   : > { %p972_p10 = pneg %p971_p9  ;;  %p978_p13 = por %p977_p11, %p976_p7 }
  0x3d   : > { %p979_p1 = pnand %p978_p13, %p972_p10 }
  0x3f   : > { %982 = shalt.err (!%p979_p1)
}
  0x40   : > { %s1025_s19 = smov 128   ;;  %s1026_s24 = smov 8  }
  0x41   : > { %881 = dma.hbm_to_vmem [thread:$0]  (!%p1103_p8), %s1150_s7, 256, %s1152_s27, %s165_s25, %s1025_s19, %s1025_s19, %s1026_s24  }
  0x42   : > { %187 = sbr.rel (%p1140_p5) target bundleno = 459 (0x1cb), region = 32  ;;  %s189_s26 = sand.u32 (!%p1140_p5), 1, %s1013_s13  }
  0x43   : > { %s190_s5 = scalar_lea.sflag (!%p1140_p5), [#allocation3], %s189_s26  ;;  %s192_s6 = scalar_lea.vmem (!%p1140_p5), [#allocation2], %s189_s26 }
  0x44   : > { %p1274_p7 = scmp.ne.s32.totalorder (!%p1140_p5), %s1269_s21, 0 }
  0x49   : > { %1000 = dma.done.wait (%p1274_p7), %s190_s5, 16  }
  0x4a   : > { %1002 = vsyncadd (%p1274_p7), %s190_s5, 4294967280  ;;  %s836_s28 = sshll.u32 %s189_s26, 4  ;;  %s198_s15 = scalar_lea.sflag [#allocation5], %s189_s26 }
  0x4b   : > { %s201_s30 = scalar_lea.vmem [#allocation4], %s836_s28 }
  0x4c   : > { %1004 = dma.done.wait (%p1274_p7), %s198_s15, 256  }
  0x4d   : > { %1006 = vsyncadd (%p1274_p7), %s198_s15, 4294967040  ;;  %v248_v0 = vlaneseq  ;;  %p230_p8 = scmp.lt.s32.totalorder %s1070_s16, 1  ;;  %v1027_v1 = vmov 0.0|0.0   ;;  %vm1028_vm0 = vmmov 0   ;;  %v1029_v4 = vmov 0.0   ;;  %v295_v7 = vld [vmem:[%s201_s30] sm:$0xff] }
  0x4e   : > { %866 = vmatprep.subr.bf16.mxu0 %v1027_v1  ;;  %869 = vmatprep.subr.bf16.mxu1 %v1027_v1  ;;  %v237_v5 = vld [vmem:[%s192_s6] sm:$0x1]  ;;  %vm297_vm6 = vcmask 130048   ;;  %v1030_v29 = vmov 1966171168   ;;  %vm672_vm13 = vcmask 256000  }
  0x4f   : > { %v1192_v2 = vshrl.u32 %v248_v0, 7  ;;  %s1280_s16 = smov (!%p230_p8, %s1070_s16), 1  ;;  %857 = vmatprep.mubr.msk.f32.mxu0 %vm1028_vm0, %v1029_v4  ;;  %860 = vmatprep.mubr.msk.f32.mxu1 %vm1028_vm0, %v1029_v4  ;;  %v296_v9 = vld [vmem:[%s201_s30 + $0x8] sm:$0xff]  ;;  %v249_v21 = vand.u32 127, %v248_v0  ;;  %v410_v30 = vunpack.c.l.s4 %v1030_v29  ;;  %vm721_vm14 = vcmask 1041409  }
  0x50   : > { %s232_s23 = scalar_lea.vmem %s1265_s1, %s1280_s16  ;;  %v867_v11 = vpack.c.bf16 %v296_v9, %v295_v7  ;;  %vm723_vm15 = vcmask 1042434   ;;  %s837_s21 = sshll.u32 %s1280_s16, 3 }
  0x51   : > { %v252_v3 = vsub.s32 0, %v1192_v2  ;;  %v238_v6 = vld [vmem:[%s232_s23] sm:$0x1]  ;;  %v411_v31 = vunpack.c.0.s8 %v410_v30  ;;  %s236_s25 = scalar_lea.vmem %s1267_s3, %s837_s21 }
  0x52   : > { %vm239_vm1 = vcmp.lt.s32.totalorder %v238_v6, 15  ;;  %868 = vmatpush3.bf16.msra.mxu0 %v867_v11  ;;  %870 = vmatpush3.bf16.msra.mxu1 %v867_v11 }
  0x53   : > { %v253_v8 = vrot.slane %v237_v5, %v252_v3  ;;  %v240_v10 = vsel %vm239_vm1, %v238_v6, 15  ;;  %v1206_v33 = vsub.s32 %v411_v31, %v1192_v2  ;;  %vm727_vm1 = vcmask 1044484  }
  0x54   : > { %v271_v12 = vrot.slane %v240_v10, %v252_v3  ;;  %v241_v13 = vsub.s32 %v240_v10, %v237_v5 }
  0x55   : > { %259 = vbcast.lane.b32.xlu1 %v253_v8, 264  ;;  %255 = vbcast.lane.b32.xlu0 %v253_v8, 256 }
  0x56   : > { %v242_v14 = vadd.s32 1, %v241_v13 }
  0x58   : > { %vm243_vm2 = vcmp.gt.s32.totalorder %v242_v14, 1 }
  0x59   : > { %277 = vbcast.lane.b32.xlu1 %v271_v12, 264  ;;  %273 = vbcast.lane.b32.xlu0 %v271_v12, 256  ;;  %v244_v15 = vsel %vm243_vm2, %v242_v14, 1  ;;  %vm729_vm2 = vcmask 1045509  }
  0x5a   : > { %v245_v16 = vcvt.s32.f32 %v244_v15 }
  0x5c   : > { %921 = vrcp.f32 %v245_v16 }
  0x5d   : > { %281 = vbcast.lane.b32.xlu1 %v271_v12, 272  ;;  %263 = vbcast.lane.b32.xlu0 %v253_v8, 272 }
  0x66   : > { %v922_v17 = vpop.eup %921 }
  0x67   : > { %v390_v18 = vrot.slane %v922_v17, %v252_v3 }
  0x69   : > { %396 = vbcast.lane.b32.xlu1 %v390_v18, 264  ;;  %392 = vbcast.lane.b32.xlu0 %v390_v18, 256 }
  0x6d   : > { %400 = vbcast.lane.b32.xlu0 %v390_v18, 272 }
  0xc7   : > { %v260_v19 = vpop.permute.xlu1 %259  ;;  %v256_v20 = vpop.permute.xlu0 %255 }
  0xc8   : > { %vm266_vm3 = vcmp.ge.s32.totalorder %v249_v21, %v260_v19  ;;  %vm265_vm7 = vcmp.ge.s32.totalorder %v249_v21, %v256_v20 }
  0xcb   : > { %v278_v22 = vpop.permute.xlu1 %277  ;;  %v274_v23 = vpop.permute.xlu0 %273 }
  0xcc   : > { %vm284_vm4 = vcmp.le.s32.totalorder %v249_v21, %v278_v22  ;;  %vm283_vm5 = vcmp.le.s32.totalorder %v249_v21, %v274_v23 }
  0xcd   : > { %vm287_vm8 = vmand %vm266_vm3, %vm284_vm4  ;;  %vm732_vm3 = vcmask 259072  }
  0xce   : > { %v839_v24 = vsel %vm287_vm8, 1.0, %v1029_v4  ;;  %vm286_vm9 = vmand %vm265_vm7, %vm283_vm5 }
  0xcf   : > { %v838_v25 = vsel %vm286_vm9, 1.0, %v1029_v4  ;;  %861 = vmatmul.mubr.msk.f32.vlgmr.msra.gmra.mrb[0].mxu1 %vm297_vm6, %v839_v24  ;;  %v282_v26 = vpop.permute.xlu1 %281  ;;  %v264_v27 = vpop.permute.xlu0 %263 }
  0xd0   : > { %858 = vmatmul.mubr.msk.f32.vlgmr.msra.gmra.mrb[0].mxu0 %vm297_vm6, %v838_v25  ;;  %vm285_vm10 = vcmp.le.s32.totalorder %v249_v21, %v282_v26  ;;  %vm267_vm11 = vcmp.ge.s32.totalorder %v249_v21, %v264_v27  ;;  %863 = vmatprep.mubr.msk.f32.mxu1 %vm1028_vm0, %v1029_v4  ;;  %vm725_vm0 = vcmask 1043459  }
  0xd1   : > { %vm288_vm12 = vmand %vm267_vm11, %vm285_vm10 }
  0xd2   : > { %v840_v28 = vsel %vm288_vm12, 1.0, %v1029_v4 }
  0xd3   : > { %864 = vmatmul.mubr.msk.f32.gmra.mrb[2].mxu1 %vm297_vm6, %v840_v28 }
  0xdb   : > { %v397_v32 = vpop.permute.xlu1 %396  ;;  %v393_v34 = vpop.permute.xlu0 %392 }
  0xdf   : > { %v401_v43 = vpop.permute.xlu0 %400 }
 0x1a2   : > { %v378_v35 = vpop.f32.mrb[0].mxu1 }
 0x1a3   : > { %v373_v36 = vpop.f32.mrb[0].mxu0  ;;  %v403_v37 = vmul.f32 %v397_v32, %v378_v35  ;;  %v862_v38 = vpop.f32.mrb[1].mxu1 }
 0x1a4   : > { %v402_v39 = vmul.f32 %v393_v34, %v373_v36  ;;  %v859_v40 = vpop.f32.mrb[1].mxu0 }
 0x1a5   : > { %v457_v41 = vcombine.high %v403_v37, %v403_v37  ;;  %v464_v42 = vrot.slane %v403_v37, %v1206_v33 }
 0x1a6   : > { %v408_v44 = vcombine.high %v402_v39, %v402_v39  ;;  %v415_v45 = vrot.slane %v402_v39, %v1206_v33  ;;  %v383_v46 = vpop.f32.mrb[2].mxu1 }
 0x1a7   : > { %v471_v47 = vrot.slane %v457_v41, %v1206_v33  ;;  %v472_v48 = vcombine.high %v464_v42, %v464_v42  ;;  %v480_v49 = vrot.slane %v464_v42, %v1206_v33  ;;  %v865_v50 = vpop.f32.mrb[3].mxu1  ;;  %v404_v54 = vmul.f32 %v401_v43, %v383_v46 }
 0x1a8   : > { %v422_v51 = vrot.slane %v408_v44, %v1206_v33  ;;  %v423_v52 = vcombine.high %v415_v45, %v415_v45  ;;  %v431_v53 = vrot.slane %v415_v45, %v1206_v33 }
 0x1a9   : > { %v473_v55 = vcombine.high %v471_v47, %v471_v47  ;;  %v487_v56 = vrot.slane %v471_v47, %v1206_v33  ;;  %v494_v57 = vrot.slane %v472_v48, %v1206_v33  ;;  %v502_v58 = vcombine.high %v480_v49, %v480_v49 }
 0x1aa   : > { %v588_v59 = vrot.slane %v480_v49, %v1206_v33  ;;  %v424_v60 = vcombine.high %v422_v51, %v422_v51  ;;  %v438_v61 = vrot.slane %v422_v51, %v1206_v33  ;;  %v445_v62 = vrot.slane %v423_v52, %v1206_v33 }
 0x1ab   : > { %v501_v63 = vrot.slane %v473_v55, %v1206_v33  ;;  %v503_v0 = vcombine.high %v487_v56, %v487_v56  ;;  %v504_v1 = vcombine.high %v494_v57, %v494_v57  ;;  %v597_v2 = vcombine.low %v494_v57, %v502_v58 }
 0x1ac   : > { %v452_v3 = vrot.slane %v424_v60, %v1206_v33  ;;  %v453_v4 = vcombine.high %v431_v53, %v431_v53  ;;  %v455_v5 = vcombine.high %v445_v62, %v445_v62  ;;  %v528_v6 = vcombine.low %v431_v53, %v445_v62 }
 0x1ad   : > { %v604_v7 = vrot.slane %v597_v2, %v1206_v33  ;;  %v611_v8 = vrot.slane %v504_v1, %v1206_v33  ;;  %v620_v9 = vcombine.low %v487_v56, %v501_v63  ;;  %v634_v10 = vrot.slane %v503_v0, %v1206_v33 }
 0x1ae   : > { %v535_v11 = vrot.slane %v528_v6, %v1206_v33  ;;  %v542_v12 = vrot.slane %v453_v4, %v1206_v33  ;;  %v551_v13 = vcombine.low %v455_v5, %v438_v61  ;;  %v565_v14 = vrot.slane %v452_v3, %v1206_v33 }
 0x1af   : > { %v612_v15 = vcombine.low %v604_v7, %v611_v8  ;;  %v627_v16 = vrot.slane %v620_v9, %v1206_v33  ;;  %v844_v17 = vcombine.high %v438_v61, %v452_v3  ;;  %v512_v20 = vrot.slane %v404_v54, %v1206_v33 }
 0x1b0   : > { %v543_v18 = vcombine.low %v535_v11, %v542_v12  ;;  %v558_v19 = vrot.slane %v551_v13, %v1206_v33  ;;  %v505_v24 = vcombine.high %v501_v63, %v501_v63 }
 0x1b1   : > { %v619_v21 = vrot.slane %v612_v15, %v1206_v33  ;;  %v635_v22 = vcombine.low %v627_v16, %v634_v10  ;;  %v581_v23 = vrot.slane %v844_v17, %v1206_v33  ;;  %v513_v27 = vcombine.high %v512_v20, %v512_v20 }
 0x1b2   : > { %v550_v25 = vrot.slane %v543_v18, %v1206_v33  ;;  %v566_v26 = vcombine.low %v558_v19, %v565_v14  ;;  %v520_v28 = vrot.slane %v512_v20, %v1206_v33 }
 0x1b3   : > { %v642_v29 = vrot.slane %v635_v22, %v1206_v33  ;;  %v694_v30 = vsel %vm672_vm13, %v619_v21, -inf  ;;  %v589_v31 = vcombine.low %v581_v23, %v588_v59  ;;  %v527_v36 = vrot.slane %v513_v27, %v1206_v33 }
 0x1b4   : > { %v695_v32 = vrot.slane %v694_v30, 4  ;;  %v573_v34 = vrot.slane %v566_v26, %v1206_v33  ;;  %v673_v35 = vsel %vm672_vm13, %v550_v25, -inf  ;;  %v643_v40 = vcombine.low %v505_v24, %v520_v28 }
 0x1b5   : > { %v701_v37 = vsel %vm672_vm13, %v642_v29, -inf  ;;  %v596_v38 = vrot.slane %v589_v31, %v1206_v33  ;;  %v674_v39 = vrot.slane %v673_v35, 4  ;;  %v657_v44 = vrot.slane %v527_v36, %v1206_v33 }
 0x1b6   : > { %v696_v41 = vmax.f32 %v694_v30, %v695_v32  ;;  %v702_v42 = vrot.slane %v701_v37, 4  ;;  %v680_v43 = vsel %vm672_vm13, %v573_v34, -inf  ;;  %v650_v48 = vrot.slane %v643_v40, %v1206_v33 }
 0x1b7   : > { %v675_v45 = vmax.f32 %v673_v35, %v674_v39  ;;  %v681_v46 = vrot.slane %v680_v43, 4  ;;  %v687_v47 = vsel %vm672_vm13, %v596_v38, -inf }
 0x1b8   : > { %v697_v49 = vrot.slane %v696_v41, 2  ;;  %v703_v50 = vmax.f32 %v701_v37, %v702_v42  ;;  %v688_v51 = vrot.slane %v687_v47, 4  ;;  %v658_v54 = vcombine.low %v650_v48, %v657_v44 }
 0x1b9   : > { %v676_v52 = vrot.slane %v675_v45, 2  ;;  %v682_v53 = vmax.f32 %v680_v43, %v681_v46 }
 0x1ba   : > { %v704_v55 = vrot.slane %v703_v50, 2  ;;  %v689_v56 = vmax.f32 %v687_v47, %v688_v51  ;;  %v698_v57 = vmax.f32 %v696_v41, %v697_v49  ;;  %v665_v60 = vrot.slane %v658_v54, %v1206_v33 }
 0x1bb   : > { %v677_v58 = vmax.f32 %v675_v45, %v676_v52  ;;  %v683_v59 = vrot.slane %v682_v53, 2 }
 0x1bc   : > { %v705_v61 = vmax.f32 %v703_v50, %v704_v55  ;;  %v690_v62 = vrot.slane %v689_v56, 2  ;;  %v708_v1 = vsel %vm672_vm13, %v665_v60, -inf  ;;  %v699_v4 = vrot.slane %v698_v57, 1 }
 0x1bd   : > { %v678_v63 = vrot.slane %v677_v58, 1  ;;  %v684_v0 = vmax.f32 %v682_v53, %v683_v59  ;;  %v709_v3 = vrot.slane %v708_v1, 4 }
 0x1be   : > { %v691_v2 = vmax.f32 %v689_v56, %v690_v62  ;;  %v706_v6 = vrot.slane %v705_v61, 1  ;;  %v700_v12 = vmax.f32 %v698_v57, %v699_v4 }
 0x1bf   : > { %v685_v5 = vrot.slane %v684_v0, 1  ;;  %v710_v8 = vmax.f32 %v708_v1, %v709_v3  ;;  %v679_v9 = vmax.f32 %v677_v58, %v678_v63 }
 0x1c0   : > { %v692_v7 = vrot.slane %v691_v2, 1  ;;  %v707_v14 = vmax.f32 %v705_v61, %v706_v6 }
 0x1c1   : > { %v686_v10 = vmax.f32 %v684_v0, %v685_v5  ;;  %v711_v11 = vrot.slane %v710_v8, 2 }
 0x1c2   : > { %v693_v33 = vmax.f32 %v691_v2, %v692_v7 }
 0x1c3   : > { %v722_v13 = vsel %vm721_vm14, %v686_v10, %v679_v9  ;;  %v712_v16 = vmax.f32 %v710_v8, %v711_v11 }
 0x1c4   : > { %v724_v15 = vsel %vm723_vm15, %v693_v33, %v722_v13 }
 0x1c5   : > { %v726_v17 = vsel %vm725_vm0, %v700_v12, %v724_v15  ;;  %v713_v19 = vrot.slane %v712_v16, 1 }
 0x1c6   : > { %v728_v18 = vsel %vm727_vm1, %v707_v14, %v726_v17 }
 0x1c7   : > { %v714_v20 = vmax.f32 %v712_v16, %v713_v19 }
 0x1c9   : > { %v730_v21 = vsel %vm729_vm2, %v714_v20, %v728_v18 }
 0x1ca   : > { %733 = vst.msk [vmem:[%s236_s25] sm:$0x3f] %vm732_vm3, %v730_v21 }
 0x1cb PF: > { %p16_p12 = scmp.ge.s32.totalorder %s1073_s17, 4   ;;  %s1275_s12 = smov %s1013_s13 }
 0x1cc   : > { %s1276_s13 = smov %s1017_s14  ;;  %s1277_s14 = smov %s1083_s20 }
 0x1cd   : > { %s1278_s15 = smov %s1073_s17  ;;  %18 = sbr.rel (!%p16_p12) target bundleno = 5 (0x5), region = 88 }
 0x1d4   :  { %753 = vsyncpa [#allocation3], 1 }
 0x1d5   :  { %755 = vsyncpa [#allocation3 + $0x1], 1 }
 0x1d6   :  { %756 = vsyncpa [#allocation5], 1 }
 0x1d7   :  { %758 = vsyncpa [#allocation5 + $0x1], 1 }

</bundles_post_ra>
